<compile_context>
chip_gen: v6e
topology: v6e:2x2x1
jax: 0.10.0
libtpu: 0.0.40
codegen_flags: <defaults>
</compile_context>

<pallas_src>
import functools

import jax
import jax.numpy as jnp
from jax.experimental import pallas as pl
from jax.experimental.pallas import tpu as pltpu


def _round_up(x: int, m: int) -> int:
    return ((x + m - 1) // m) * m


def _linear_kernel(params_ref, x_ref, o_ref):
    # params_ref: (in_f + 1,) f32 in SMEM -> [w0, w1, w2, b]
    # x_ref:      (in_f, TN) f32 in VMEM (feature-major, lane-dense)
    # o_ref:      (1,   TN) f32 in VMEM
    x = x_ref[...]                       # (in_f, TN)
    in_f = x.shape[0]
    bias = params_ref[in_f]              # scalar
    acc = jnp.full(o_ref.shape, bias, dtype=jnp.float32)
    for k in range(in_f):                # static unroll: pure VPU FMAs
        acc = acc + x[k:k + 1, :] * params_ref[k]
    o_ref[...] = acc.astype(o_ref.dtype)


@functools.partial(jax.jit, static_argnames=("block_n",))
def poly_model_forward(x, weight, bias, *, block_n: int = 32768):
    """x: (N, 3) f32; weight: (1, 3) f32 (PyTorch convention); bias: (1,) f32."""
    n, in_f = x.shape
    out_f = weight.shape[0]

    # Feature-major, lane-dense layout for the kernel: x -> (in_f, N).
    xt = x.T

    # Tile the lane (batch) axis; pad N up to a multiple of the block.
    bn = min(block_n, _round_up(n, 128))
    bn = _round_up(bn, 128)
    padded_n = _round_up(n, bn)
    if padded_n != n:
        xt = jnp.pad(xt, ((0, 0), (0, padded_n - n)))

    # All 4 parameters as one tiny f32 vector in SMEM: [w0, w1, w2, b].
    params = jnp.concatenate(
        [weight.reshape(out_f * in_f), bias.reshape(out_f)]
    ).astype(jnp.float32)

    grid = (padded_n // bn,)

    out_t = pl.pallas_call(
        _linear_kernel,
        out_shape=jax.ShapeDtypeStruct((out_f, padded_n), x.dtype),
        grid_spec=pltpu.PrefetchScalarGridSpec(
            num_scalar_prefetch=0,
            grid=grid,
            in_specs=[
                # Scalars (weights + bias) live in SMEM, untiled.
                pl.BlockSpec(memory_space=pltpu.MemorySpace.SMEM),
                # Lane-dense input tile: (3, TN), TN a multiple of 128.
                pl.BlockSpec((in_f, bn), lambda i: (0, i)),
            ],
            out_specs=pl.BlockSpec((out_f, bn), lambda i: (0, i)),
        ),
        compiler_params=pltpu.CompilerParams(
            dimension_semantics=("parallel",),
        ),
        cost_estimate=pl.CostEstimate(
            flops=(2 * in_f + 1) * n,
            transcendentals=0,
            bytes_accessed=4 * n * (in_f + out_f) + 4 * (in_f + out_f),
        ),
    )(params, xt)

    # Back to the PyTorch output layout (N, 1).
    return out_t[:, :n].T


if __name__ == "__main__":
    key = jax.random.PRNGKey(0)
    kx, kw, kb, kx2 = jax.random.split(key, 4)

    in_features = 3
    out_features = 1

    # Deterministic parameter init (mirrors nn.Linear's uniform(-1/sqrt(3), 1/sqrt(3))).
    bound = 1.0 / jnp.sqrt(jnp.float32(in_features))
    weight = jax.random.uniform(kw, (out_features, in_features),
                                minval=-bound, maxval=bound, dtype=jnp.float32)
    bias = jax.random.uniform(kb, (out_features,),
                              minval=-bound, maxval=bound, dtype=jnp.float32)

    # Small primary test.
    batch = 8
    x = jax.random.normal(kx, (batch, in_features), dtype=jnp.float32)
    out = jax.block_until_ready(poly_model_forward(x, weight, bias))
    ref = x @ weight.T + bias
    assert out.shape == (batch, out_features)
    assert jnp.allclose(out, ref, atol=1e-5, rtol=1e-5)

    # Secondary test: non-multiple batch exercises tiling + padding path.
    batch2 = 1000
    x2 = jax.random.normal(kx2, (batch2, in_features), dtype=jnp.float32)
    out2 = jax.block_until_ready(
        poly_model_forward(x2, weight, bias, block_n=512))
    ref2 = x2 @ weight.T + bias
    assert out2.shape == (batch2, out_features)
    assert jnp.allclose(out2, ref2, atol=1e-5, rtol=1e-5)

    print("KERNEL_OK")
</pallas_src>

<mosaic_0001>
module attributes {stable_mosaic.version = 11 : i64} {
  func.func @_linear_kernel(%arg0: i32, %arg1: memref<4xf32, #tpu.memory_space<smem>>, %arg2: memref<3x128xf32, #tpu.memory_space<vmem>>, %arg3: memref<1x128xf32, #tpu.memory_space<vmem>>) attributes {dimension_semantics = [#tpu.dimension_semantics<parallel>], iteration_bounds = array<i64: 1>, scalar_prefetch = 0 : i64, scratch_operands = 0 : i64, tpu.core_type = #tpu.core_type<tc>, window_params = [{transform_indices = @transform_0, window_bounds = array<i64: 4>}, {transform_indices = @transform_1, window_bounds = array<i64: 3, 128>}, {transform_indices = @transform_2, window_bounds = array<i64: 1, 128>}]} {
    %c0 = arith.constant 0 : index
    %c0_0 = arith.constant 0 : index
    %0 = vector.load %arg2[%c0, %c0_0] : memref<3x128xf32, #tpu.memory_space<vmem>>, vector<3x128xf32>
    %c3 = arith.constant 3 : index
    %1 = memref.load %arg1[%c3] : memref<4xf32, #tpu.memory_space<smem>>
    %2 = vector.broadcast %1 : f32 to vector<1x128xf32>
    %3 = vector.extract_strided_slice %0 {offsets = [0, 0], sizes = [1, 128], strides = [1, 1]} : vector<3x128xf32> to vector<1x128xf32>
    %c0_1 = arith.constant 0 : index
    %4 = memref.load %arg1[%c0_1] : memref<4xf32, #tpu.memory_space<smem>>
    %5 = vector.broadcast %4 : f32 to vector<1x128xf32>
    %6 = arith.mulf %3, %5 : vector<1x128xf32>
    %7 = arith.addf %2, %6 : vector<1x128xf32>
    %8 = vector.extract_strided_slice %0 {offsets = [1, 0], sizes = [1, 128], strides = [1, 1]} : vector<3x128xf32> to vector<1x128xf32>
    %c1 = arith.constant 1 : index
    %9 = memref.load %arg1[%c1] : memref<4xf32, #tpu.memory_space<smem>>
    %10 = vector.broadcast %9 : f32 to vector<1x128xf32>
    %11 = arith.mulf %8, %10 : vector<1x128xf32>
    %12 = arith.addf %7, %11 : vector<1x128xf32>
    %13 = vector.extract_strided_slice %0 {offsets = [2, 0], sizes = [1, 128], strides = [1, 1]} : vector<3x128xf32> to vector<1x128xf32>
    %c2 = arith.constant 2 : index
    %14 = memref.load %arg1[%c2] : memref<4xf32, #tpu.memory_space<smem>>
    %15 = vector.broadcast %14 : f32 to vector<1x128xf32>
    %16 = arith.mulf %13, %15 : vector<1x128xf32>
    %17 = arith.addf %12, %16 : vector<1x128xf32>
    %c0_2 = arith.constant 0 : index
    %c0_3 = arith.constant 0 : index
    %18 = vector.load %arg3[%c0_2, %c0_3] : memref<1x128xf32, #tpu.memory_space<vmem>>, vector<1x128xf32>
    tpu.vector_store %arg3[%c0_2, %c0_3], %17 {strides = array<i32>} : memref<1x128xf32, #tpu.memory_space<vmem>>, vector<1x128xf32>,
    return
  }
  func.func @transform_0(%arg0: i32) -> i32 {
    %c0_i32 = arith.constant 0 : i32
    %c0_i32_0 = arith.constant 0 : i32
    return %c0_i32 : i32
  }
  func.func @transform_1(%arg0: i32) -> (i32, i32) {
    %c0_i32 = arith.constant 0 : i32
    %c0_i32_0 = arith.constant 0 : i32
    return %c0_i32, %arg0 : i32, i32
  }
  func.func @transform_2(%arg0: i32) -> (i32, i32) {
    %c0_i32 = arith.constant 0 : i32
    %c0_i32_0 = arith.constant 0 : i32
    return %c0_i32, %arg0 : i32, i32
  }
}

</mosaic_0001>

<bundles_post_ra>
// kernel: poly_model_forward.1
= control target key start
LH: loop header
LB: loop body
LE: loop exit
PB: predicated region body
PF: predicated region fallthrough
CT: control target
= control target key end

     0   :  { %7 = vsyncpa [#allocation3], 0  ;;  %s94_s0 = inlined_call_operand.vmem [shape: f32[4], index: 0, kind: input, shape index: {}]   ;;  %s95_s1 = inlined_call_operand.vmem [shape: f32[3,128], index: 1, kind: input, shape index: {}]   ;;  %s96_s2 = inlined_call_operand.vmem [shape: f32[1,128], index: 2, kind: output, shape index: {}]  }
   0x1   :  { %s14_s11 = sshll.u32 %s94_s0, 4  ;;  %s15_s11 = int_to_ptr.vmem [resolvable:$true] %s14_s11 }
   0x2   :  { %s55_s12 = scalar_lea.vmem %s15_s11, 16  ;;  %p60_p1 = scmp.lt.s32.totalorder %s15_s11, %s15_s11 }
   0x3   :  { %p56_p0 = scmp.ne.s32.totalorder %s15_s11, %s55_s12  ;;  %p61_p2 = scmp.lt.s32.totalorder %s55_s12, %s55_s12 }
   0x5   :  { %p62_p3 = por %p61_p2, %p60_p1 }
   0x7   :  { %p63_p4 = pnand %p62_p3, %p56_p0 }
   0x9   :  { %66 = shalt.err (!%p63_p4)
}
   0xa   :  { %s69_s13 = smov [#allocation2]  }
   0xb   :  { %17 = dma.vmem_to_smem %s15_s11, 16, %s69_s13, [#allocation3]  }
   0xc   :  { %67 = dma.done.wait [#allocation3], 16  }
   0xd   :  { %68 = vsyncadd [#allocation3], 4294967280 }
   0xe   :  { %23 = sfence }
   0xf   :  { %s51_s14 = sld [smem:[#allocation2 + $0x3]]  ;;  %v24_v0 = vld [vmem:[%s95_s1] sm:$0x7] }
  0x10   :  { %s27_s15 = sld [smem:[#allocation2]] }
  0x11   :  { %s52_s16 = sld [smem:[#allocation2 + $0x1]] }
  0x12   :  { %s53_s17 = sld [smem:[#allocation2 + $0x2]] }
  0x15   :  { %v26_v1 = vstv %s51_s14 }
  0x16   :  { %v28_v2 = vstv %s27_s15 }
  0x17   :  { %v29_v3 = vmul.f32 %v28_v2, %v24_v0  ;;  %v32_v4 = vstv %s52_s16 }
  0x18   :  { %v33_v5 = vmul.f32 %v32_v4, %v24_v0  ;;  %v39_v6 = vstv %s53_s17 }
  0x19   :  { %v30_v7 = vadd.f32 %v29_v3, %v26_v1  ;;  %v40_v8 = vmul.f32 %v39_v6, %v24_v0 }
  0x1a   :  { %v35_v9 = vrot.slane %v33_v5, 1 }
  0x1b   :  { %v42_v10 = vrot.slane %v40_v8, 2 }
  0x1c   :  { %v37_v11 = vadd.f32 %v35_v9, %v30_v7 }
  0x1e   :  { %v44_v12 = vadd.f32 %v42_v10, %v37_v11 }
  0x20   :  { %45 = vst [vmem:[%s96_s2] sm:$0x1] %v44_v12 }
  0x21   :  { %50 = vsyncpa [#allocation3], 1 }

</bundles_post_ra>
